<compile_context>
chip_gen: v7x
topology: tpu7x:2x2x1
jax: 0.10.0
libtpu: 0.0.40
codegen_flags: <defaults>
</compile_context>

<pallas_src>
import jax
import jax.numpy as jnp
from jax.experimental import pallas as pl
from jax.experimental.pallas import tpu as pltpu


def mlp_kernel(xT_ref, w1_ref, w2_ref, b2_ref, o_ref):
    # xT: (11, TILE) bf16 (row 10 == ones)   w1: (50, 11) bf16 (col 10 == b1)
    # w2: (50, 1) f32                        b2: (1,) f32 in SMEM
    # o : (1, TILE) f32
    h = jnp.dot(w1_ref[...], xT_ref[...],
                preferred_element_type=jnp.float32)          # (50, TILE), MXU, f32 acc (b1 folded in)
    h = jnp.maximum(h, 0.0)                                  # ReLU on VPU
    # Layer 2 off the MXU: VPU broadcast-multiply + XLU cross-sublane reduce.
    y = jnp.sum(h * w2_ref[...], axis=0, keepdims=True)      # (1, TILE) f32
    o_ref[...] = (y + b2_ref[0]).astype(o_ref.dtype)


def _pick_tile(B, desired):
    """Pick a lane-tile: big enough to amortize ~0.35us/step grid overhead, capped at
    32K lanes for v7x VMEM, and small enough that the grid has >=2 steps when B allows
    (so v7x's two TensorCores both get work)."""
    b128 = pl.cdiv(B, 128) * 128
    if b128 <= 128:
        return 128
    half = pl.cdiv(b128, 2 * 128) * 128          # round_up(b128/2, 128) -> grid >= 2
    return max(128, min(desired, 32768, half))


def simple_nn_forward(x, w1, b1, w2, b2, *, tile=16384):
    """x: (B, 10) f32. Params in PyTorch layout: w1 (50,10), b1 (50,), w2 (1,50), b2 (1,).
    Returns (B, 1) f32."""
    B, in_f = x.shape
    hid = w1.shape[0]

    tile = _pick_tile(B, tile)
    B_pad = pl.cdiv(B, tile) * tile
    grid = (B_pad // tile,)

    # Layout plumbing: batch -> lanes, bf16 for the layer-1 operands, b1 folded as an
    # extra contraction row/column (K=10 -> 11; free inside the MXU's padded K).
    xT = jnp.pad(x.T, ((0, 0), (0, B_pad - B))).astype(jnp.bfloat16)       # (10, B_pad)
    ones_row = jnp.ones((1, B_pad), jnp.bfloat16)
    xT_aug = jnp.concatenate([xT, ones_row], axis=0)                       # (11, B_pad)
    w1_aug = jnp.concatenate(
        [w1.astype(jnp.float32), b1.reshape(hid, 1).astype(jnp.float32)],
        axis=1).astype(jnp.bfloat16)                                       # (50, 11)
    w2_col = w2.reshape(hid, 1).astype(jnp.float32)                        # (50, 1)
    b2s = b2.reshape(1).astype(jnp.float32)                                # (1,) SMEM scalar

    k = in_f + 1
    out = pl.pallas_call(
        mlp_kernel,
        out_shape=jax.ShapeDtypeStruct((1, B_pad), jnp.float32),
        grid=grid,
        in_specs=[
            pl.BlockSpec((k, tile), lambda i: (0, i)),      # batch-tiled activations
            pl.BlockSpec((hid, k), lambda i: (0, 0)),       # weights stay VMEM-resident
            pl.BlockSpec((hid, 1), lambda i: (0, 0)),       # w2 column for VPU layer 2
            pl.BlockSpec(memory_space=pltpu.MemorySpace.SMEM),
        ],
        out_specs=pl.BlockSpec((1, tile), lambda i: (0, i)),
        compiler_params=pltpu.CompilerParams(
            dimension_semantics=("parallel",)),             # v7x: shard tiles over both TCs
    )(xT_aug, w1_aug, w2_col, b2s)

    # Drop padding columns, restore (B, 1) PyTorch output shape.
    return out[0, :B].reshape(B, 1)


def init_params(key):
    # PyTorch nn.Linear layout: weight (out, in), bias (out,), U(-1/sqrt(fan_in), +1/sqrt(fan_in)).
    k1, k2, k3, k4 = jax.random.split(key, 4)
    bound1 = 1.0 / jnp.sqrt(10.0)
    bound2 = 1.0 / jnp.sqrt(50.0)
    w1 = jax.random.uniform(k1, (50, 10), jnp.float32, -bound1, bound1)
    b1 = jax.random.uniform(k2, (50,), jnp.float32, -bound1, bound1)
    w2 = jax.random.uniform(k3, (1, 50), jnp.float32, -bound2, bound2)
    b2 = jax.random.uniform(k4, (1,), jnp.float32, -bound2, bound2)
    return w1, b1, w2, b2


def _reference(x, w1, b1, w2, b2):
    return jnp.maximum(x @ w1.T + b1, 0.0) @ w2.T + b2


if __name__ == "__main__":
    key = jax.random.PRNGKey(0)
    kx, kx2, kp = jax.random.split(key, 3)
    w1, b1, w2, b2 = init_params(kp)

    # Small single-tile case.
    B = 8
    x = jax.random.normal(kx, (B, 10), jnp.float32)
    out = jax.block_until_ready(simple_nn_forward(x, w1, b1, w2, b2))
    ref = _reference(x, w1, b1, w2, b2)
    assert out.shape == (B, 1)
    # bf16 activation/weight loads (and folded bf16 bias) -> loosened tolerance vs f32 ref.
    assert jnp.allclose(out, ref, atol=2e-2, rtol=2e-2)

    # Non-multiple batch exercising padding and a >=2-step grid.
    B2 = 300
    x2 = jax.random.normal(kx2, (B2, 10), jnp.float32)
    out2 = jax.block_until_ready(simple_nn_forward(x2, w1, b1, w2, b2))
    ref2 = _reference(x2, w1, b1, w2, b2)
    assert out2.shape == (B2, 1)
    assert jnp.allclose(out2, ref2, atol=2e-2, rtol=2e-2)

    print("KERNEL_OK")
</pallas_src>

<mosaic_0001>
module attributes {stable_mosaic.version = 11 : i64} {
  func.func @mlp_kernel(%arg0: i32, %arg1: memref<11x128xbf16, #tpu.memory_space<vmem>>, %arg2: memref<50x11xbf16, #tpu.memory_space<vmem>>, %arg3: memref<50x1xf32, #tpu.memory_space<vmem>>, %arg4: memref<1xf32, #tpu.memory_space<smem>>, %arg5: memref<1x128xf32, #tpu.memory_space<vmem>>) attributes {dimension_semantics = [#tpu.dimension_semantics<parallel>], iteration_bounds = array<i64: 1>, scalar_prefetch = 0 : i64, scratch_operands = 0 : i64, tpu.core_type = #tpu.core_type<tc>, window_params = [{transform_indices = @transform_0, window_bounds = array<i64: 11, 128>}, {pipeline_mode = #tpu.pipeline_mode<synchronous>, transform_indices = @transform_1, window_bounds = array<i64: 50, 11>}, {pipeline_mode = #tpu.pipeline_mode<synchronous>, transform_indices = @transform_2, window_bounds = array<i64: 50, 1>}, {transform_indices = @transform_3, window_bounds = array<i64: 1>}, {transform_indices = @transform_4, window_bounds = array<i64: 1, 128>}]} {
    %c0 = arith.constant 0 : index
    %c0_0 = arith.constant 0 : index
    %0 = vector.load %arg2[%c0, %c0_0] : memref<50x11xbf16, #tpu.memory_space<vmem>>, vector<50x11xbf16>
    %c0_1 = arith.constant 0 : index
    %c0_2 = arith.constant 0 : index
    %1 = vector.load %arg1[%c0_1, %c0_2] : memref<11x128xbf16, #tpu.memory_space<vmem>>, vector<11x128xbf16>
    %cst = arith.constant dense<0.000000e+00> : vector<50x128xf32>
    %2 = tpu.matmul %0, %1, %cst {dimension_numbers = #tpu.dot_dimension_numbers<[1], [0], [0], [1], [0, 0, 1, 1], [], []>} : vector<50x11xbf16>, vector<11x128xbf16>, vector<50x128xf32> -> vector<50x128xf32>
    %cst_3 = arith.constant 0.000000e+00 : f32
    %3 = vector.broadcast %cst_3 : f32 to vector<50x128xf32>
    %4 = arith.maximumf %2, %3 : vector<50x128xf32>
    %c0_4 = arith.constant 0 : index
    %c0_5 = arith.constant 0 : index
    %5 = vector.load %arg3[%c0_4, %c0_5] : memref<50x1xf32, #tpu.memory_space<vmem>>, vector<50x1xf32>
    %6 = vector.broadcast %5 : vector<50x1xf32> to vector<50x128xf32>
    %7 = arith.mulf %4, %6 : vector<50x128xf32>
    %cst_6 = arith.constant dense<0.000000e+00> : vector<128xf32>
    %8 = vector.multi_reduction <add>, %7, %cst_6 [0] : vector<50x128xf32> to vector<128xf32>
    %9 = vector.shape_cast %8 : vector<128xf32> to vector<1x128xf32>
    %c0_7 = arith.constant 0 : index
    %10 = memref.load %arg4[%c0_7] : memref<1xf32, #tpu.memory_space<smem>>
    %11 = vector.broadcast %10 : f32 to vector<1x128xf32>
    %12 = arith.addf %9, %11 : vector<1x128xf32>
    %c0_8 = arith.constant 0 : index
    %c0_9 = arith.constant 0 : index
    %13 = vector.load %arg5[%c0_8, %c0_9] : memref<1x128xf32, #tpu.memory_space<vmem>>, vector<1x128xf32>
    tpu.vector_store %arg5[%c0_8, %c0_9], %12 {strides = array<i32>} : memref<1x128xf32, #tpu.memory_space<vmem>>, vector<1x128xf32>,
    return
  }
  func.func @transform_0(%arg0: i32) -> (i32, i32) {
    %c0_i32 = arith.constant 0 : i32
    %c0_i32_0 = arith.constant 0 : i32
    return %c0_i32, %arg0 : i32, i32
  }
  func.func @transform_1(%arg0: i32) -> (i32, i32) {
    %c0_i32 = arith.constant 0 : i32
    %c0_i32_0 = arith.constant 0 : i32
    %c0_i32_1 = arith.constant 0 : i32
    return %c0_i32, %c0_i32_0 : i32, i32
  }
  func.func @transform_2(%arg0: i32) -> (i32, i32) {
    %c0_i32 = arith.constant 0 : i32
    %c0_i32_0 = arith.constant 0 : i32
    %c0_i32_1 = arith.constant 0 : i32
    return %c0_i32, %c0_i32_0 : i32, i32
  }
  func.func @transform_3(%arg0: i32) -> i32 {
    %c0_i32 = arith.constant 0 : i32
    %c0_i32_0 = arith.constant 0 : i32
    return %c0_i32 : i32
  }
  func.func @transform_4(%arg0: i32) -> (i32, i32) {
    %c0_i32 = arith.constant 0 : i32
    %c0_i32_0 = arith.constant 0 : i32
    return %c0_i32, %arg0 : i32, i32
  }
}

</mosaic_0001>

<bundles_post_ra>
// kernel: tpu_custom_call.1
= control target key start
LH: loop header
LB: loop body
LE: loop exit
PB: predicated region body
PF: predicated region fallthrough
CT: control target
= control target key end

     0   :  { %vm65_vm0 = vcmask 1044480   ;;  %vm66_vm1 = vcmask 1045504   ;;  %v284_v2 = vmov 65535   ;;  %vm52_vm2 = vcmask 89088   ;;  %s367_s0 = inlined_call_operand.vmem [shape: bf16[11,128], index: 0, kind: input, shape index: {}]   ;;  %s368_s1 = inlined_call_operand.vmem [shape: bf16[50,11], index: 1, kind: input, shape index: {}]   ;;  %s369_s2 = inlined_call_operand.vmem [shape: f32[50,1], index: 2, kind: input, shape index: {}]   ;;  %s370_s3 = inlined_call_operand.<no memory space> [shape: f32[1], index: 3, kind: input, shape index: {}]   ;;  %s371_s4 = inlined_call_operand.hbm [shape: f32[1,128], index: 4, kind: output, shape index: {}]  }
   0x1   :  { %v255_v0 = vld [vmem:[%s367_s0] sm:$0x3f]   ;;  %v67_v3 = vsel %vm65_vm0, 4294967295, %v284_v2  ;;  %v257_v5 = vld [vmem:[%s368_s1 + $0x10] sm:$0xff]   ;;  %v285_v7 = vmov 0   ;;  %v258_v9 = vld [vmem:[%s368_s1 + $0x8] sm:$0xff]  }
   0x2   :  { %v256_v1 = vld [vmem:[%s368_s1] sm:$0xff]   ;;  %v68_v4 = vsel %vm66_vm1, %v67_v3, 0  ;;  %244 = vmatprep.mubr.msk.bf16.mxu1 %vm52_vm2, %v257_v5  ;;  %253 = vset.pattern.permute.xlu0 %v285_v7  ;;  %v259_v10 = vld [vmem:[%s368_s1 + $0x18] ss:$0 sps:$4 sm:$0x11]   ;;  %v145_v11 = vld [vmem:[%s369_s2 + $0x10] sm:$0xff] }
   0x3   :  { %240 = vmatprep.mubr.msk.bf16.mxu0 %vm52_vm2, %v256_v1  ;;  %v70_v6 = vand.u32 %v255_v0, %v68_v4  ;;  %v143_v8 = vld [vmem:[%s369_s2] sm:$0xff] }
   0x5   :  { %238 = vmatprep.subr.bf16.mxu0 %v70_v6  ;;  %248 = vmatprep.subr.bf16.mxu1 %v70_v6 }
   0x6   :  { %239 = vmatpush3.bf16.msra.mxu0 %v70_v6  ;;  %249 = vmatpush3.bf16.msra.mxu1 %v70_v6 }
   0x7   :  { %10 = vsyncpa [#allocation4], 0  ;;  %152 = vperm.xlu0 %253, %v143_v8   ;;  %254 = vset.pattern.permute.xlu1 %v285_v7  ;;  %v144_v12 = vld [vmem:[%s369_s2 + $0x8] sm:$0xff]  ;;  %v146_v13 = vld [vmem:[%s369_s2 + $0x18] sm:$0xff]  ;;  %vm197_vm3 = vcmask 1041408   ;;  %v207_v58 = vstv %s370_s3  ;;  %s286_s12 = smov [#allocation3]  }
   0x8   :  { %162 = vperm.xlu1 %254, %v145_v11   ;;  %v147_v14 = vld [vmem:[%s369_s2 + $0x20] sm:$0xff]  ;;  %v148_v15 = vld [vmem:[%s369_s2 + $0x28] sm:$0xff]  ;;  %v149_v16 = vld [vmem:[%s369_s2 + $0x30] sm:$0x3]  ;;  %s216_s13 = sshll.u32 %s286_s12, 4  ;;  %s217_s13 = int_to_ptr.vmem [resolvable:$true] %s216_s13 }
   0x9   :  { %241 = vmatmul.mubr.msk.bf16.vlgmr.msra.gmra.mrb[0].mxu0 %vm52_vm2, %v258_v9  ;;  %245 = vmatmul.mubr.msk.bf16.vlgmr.msra.gmra.mrb[0].mxu1 %vm52_vm2, %v259_v10  ;;  %s260_s14 = scalar_lea.vmem %s217_s13, 16  ;;  %s264_s15 = scalar_lea.vmem %s217_s13, 32 }
   0xa   :  { %p261_p0 = scmp.ne.s32.totalorder %s217_s13, %s260_s14  ;;  %p265_p1 = scmp.lt.s32.totalorder %s217_s13, %s217_s13 }
   0xb   :  { %157 = vperm.xlu0 %253, %v144_v12   ;;  %p266_p2 = scmp.lt.s32.totalorder %s264_s15, %s260_s14 }
   0xc   :  { %167 = vperm.xlu1 %254, %v146_v13  }
   0xd   :  { %p267_p3 = por %p266_p2, %p265_p1 }
   0xf   :  { %172 = vperm.xlu0 %253, %v147_v14   ;;  %p268_p4 = pnand %p267_p3, %p261_p0 }
  0x10   :  { %177 = vperm.xlu1 %254, %v148_v15  }
  0x13   :  { %182 = vperm.xlu0 %253, %v149_v16  }
  0x86   :  { %v153_v17 = vpop.permute.xlu0 %152 }
  0x87   :  { %v163_v19 = vpop.permute.xlu1 %162 }
  0x8a   :  { %v158_v18 = vpop.permute.xlu0 %157 }
  0x8b   :  { %v168_v32 = vpop.permute.xlu1 %167 }
  0x8e   :  { %v173_v29 = vpop.permute.xlu0 %172 }
  0x8f   :  { %v178_v44 = vpop.permute.xlu1 %177 }
  0x92   :  { %v183_v40 = vpop.permute.xlu0 %182 }
  0xdc   :  { %v242_v20 = vpop.f32.mrb[0].mxu0  ;;  %v246_v21 = vpop.f32.mrb[0].mxu1 }
  0xdd   :  { %v106_v22 = vpop.f32.mrb[1].mxu0  ;;  %v122_v23 = vpop.f32.mrb[1].mxu1  ;;  %v138_v30 = vmax.f32 %v242_v20, 0.0  ;;  %v142_v39 = vmax.f32 %v246_v21, 0.0 }
  0xde   :  { %v136_v24 = vmax.f32 %v106_v22, 0.0  ;;  %v243_v25 = vpop.f32.mrb[2].mxu0  ;;  %v247_v26 = vpop.f32.mrb[2].mxu1  ;;  %v140_v37 = vmax.f32 %v122_v23, 0.0 }
  0xdf   :  { %v109_v27 = vpop.f32.mrb[3].mxu0  ;;  %v125_v28 = vpop.f32.mrb[3].mxu1  ;;  %v139_v34 = vmax.f32 %v243_v25, 0.0  ;;  %v187_v36 = vmul.f32 %v163_v19, %v138_v30  ;;  %v191_v47 = vmul.f32 %v183_v40, %v142_v39 }
  0xe0   :  { %v137_v31 = vmax.f32 %v109_v27, 0.0  ;;  %v185_v33 = vmul.f32 %v153_v17, %v136_v24  ;;  %v141_v43 = vmax.f32 %v125_v28, 0.0  ;;  %v189_v45 = vmul.f32 %v173_v29, %v140_v37 }
  0xe1   :  { %v188_v41 = vmul.f32 %v168_v32, %v139_v34  ;;  %v198_v51 = vsel %vm197_vm3, %v191_v47, 0.0 }
  0xe2   :  { %v186_v35 = vmul.f32 %v158_v18, %v137_v31  ;;  %v190_v48 = vmul.f32 %v178_v44, %v141_v43 }
  0xe4   :  { %v192_v38 = vadd.f32 %v186_v35, %v185_v33 }
  0xe6   :  { %v193_v42 = vadd.f32 %v192_v38, %v187_v36 }
  0xe8   :  { %v194_v46 = vadd.f32 %v193_v42, %v188_v41 }
  0xea   :  { %v195_v49 = vadd.f32 %v194_v46, %v189_v45 }
  0xec   :  { %v196_v50 = vadd.f32 %v195_v49, %v190_v48 }
  0xee   :  { %v199_v52 = vadd.f32 %v198_v51, %v196_v50 }
  0xf0   :  { %v200_v53 = vrot.slane %v199_v52, 4 }
  0xf2   :  { %v201_v54 = vadd.f32 %v200_v53, %v199_v52 }
  0xf4   :  { %v202_v55 = vrot.slane %v201_v54, 2 }
  0xf6   :  { %v203_v56 = vadd.f32 %v202_v55, %v201_v54 }
  0xf8   :  { %v204_v57 = vrot.slane %v203_v56, 1 }
  0xfa   :  { %v205_v59 = vadd.f32 %v204_v57, %v203_v56 }
  0xfc   :  { %v208_v60 = vadd.f32 %v207_v58, %v205_v59 }
  0xfe   :  { %209 = vst [vmem:[#allocation3] sm:$0x1] %v208_v60 }
  0xff   :  { %271 = shalt.err (!%p268_p4)
}
 0x100   :  { %s272_s18 = scalar_lea.hbm %s371_s4, 16 }
 0x101   :  { %p273_p5 = scmp.ne.s32.totalorder %s371_s4, %s272_s18  ;;  %p276_p6 = scmp.lt.u32.totalorder %s272_s18, %s371_s4 }
 0x103   :  { %p278_p7 = pnand %p276_p6, %p273_p5 }
 0x105   :  { %281 = shalt.err (!%p278_p7)
}
 0x106   :  { %219 = dma.vmem_to_hbm [thread:$0]  %s217_s13, 16, %s371_s4, [#allocation4]  }
 0x107   :  { %282 = dma.done.wait [#allocation4], 16  }
 0x108   :  { %283 = vsyncadd [#allocation4], 4294967280 }
 0x109   :  { %223 = vsyncpa [#allocation4], 1 }

</bundles_post_ra>
